<compile_context>
chip_gen: v7x
topology: tpu7x:2x2x1
jax: 0.10.0
libtpu: 0.0.40
codegen_flags: <defaults>
</compile_context>

<pallas_src>
import functools

import jax
import jax.numpy as jnp
import numpy as np
from jax.experimental import pallas as pl
from jax.experimental.pallas import tpu as pltpu

NUMP = 4      # number of joints (`nump` in the reference module)
_LANE = 128
_MAX_TM = 512  # row tile; 2 inputs x 2 buffers x 512x128x4B ~= 1 MiB VMEM


def _round_up(x, m):
    return ((x + m - 1) // m) * m


def _kl_kernel(pred_ref, tgt_ref, scale_ref, out_ref, *, beta, label_softmax):
    """out[r, 0] = scale[r] * sum_w KL(log_softmax(beta*pred[r]), tgt[r])[w]."""
    pred = pred_ref[...].astype(jnp.float32)            # (TM, WL)
    tgt = tgt_ref[...].astype(jnp.float32)              # (TM, WL)

    # log_softmax(pred * beta) along lanes. Padded pred lanes are ~-1e30 so
    # they never win the max and their exp() underflows to exactly 0.
    z = pred * beta
    z_max = jnp.max(z, axis=-1, keepdims=True)
    z_shift = z - z_max
    lse = jnp.log(jnp.sum(jnp.exp(z_shift), axis=-1, keepdims=True))
    log_pt = z_shift - lse

    if label_softmax:
        # Log-space softmax of the labels: no exp -> divide round trip.
        t = tgt * beta
        t_max = jnp.max(t, axis=-1, keepdims=True)
        t_shift = t - t_max
        t_lse = jnp.log(jnp.sum(jnp.exp(t_shift), axis=-1, keepdims=True))
        log_tgt = t_shift - t_lse
        tgt_sm = jnp.exp(log_tgt)
        kl = jnp.where(tgt_sm > 0.0, tgt_sm * (log_tgt - log_pt), 0.0)
    else:
        # PyTorch KLDivLoss(reduction='none'): target*(log(target)-input),
        # defined as 0 where target <= 0 (this also covers padded lanes).
        pos = tgt > 0.0
        safe_tgt = jnp.where(pos, tgt, 1.0)
        kl = jnp.where(pos, tgt * (jnp.log(safe_tgt) - log_pt), 0.0)

    # The row mean's 1/W, the mask and target_weight are folded into scale.
    row = jnp.sum(kl, axis=-1, keepdims=True)            # (TM, 1)
    out_ref[...] = row * scale_ref[...]


def _kl_rows_weighted(pred, tgt, scale, beta, label_softmax, tm):
    """Per-row weighted KL losses for a lane-dense (Mp, WL) row stack."""
    mp, wl = pred.shape
    kernel = functools.partial(_kl_kernel, beta=beta,
                               label_softmax=label_softmax)
    return pl.pallas_call(
        kernel,
        out_shape=jax.ShapeDtypeStruct((mp, 1), jnp.float32),
        grid_spec=pltpu.PrefetchScalarGridSpec(
            num_scalar_prefetch=0,
            grid=(mp // tm,),
            in_specs=[
                pl.BlockSpec((tm, wl), lambda i: (i, 0)),
                pl.BlockSpec((tm, wl), lambda i: (i, 0)),
                pl.BlockSpec((tm, 1), lambda i: (i, 0)),
            ],
            out_specs=pl.BlockSpec((tm, 1), lambda i: (i, 0)),
        ),
        compiler_params=pltpu.CompilerParams(
            dimension_semantics=("parallel",)),   # independent tiles -> v7x megacore
    )(pred, tgt, scale)


def kl_discret_loss(pred_simcc, gt_simcc, mask, target_weight=None,
                    beta=1.0, label_softmax=False, use_target_weight=True):
    """Pallas implementation of KLDiscretLoss.forward. Returns a scalar."""
    num_joints = pred_simcc[0].shape[1]
    m_rows = pred_simcc[0].shape[0] * num_joints
    mask_flat = mask.reshape(-1).astype(jnp.float32)
    if use_target_weight and target_weight is not None:
        weight = target_weight.reshape(-1).astype(jnp.float32)
    else:
        weight = jnp.ones((m_rows,), jnp.float32)

    # Fold the mask into the per-row scale. Exact for binary visibility masks
    # (masked rows contribute exactly 0 either way, given finite inputs).
    base_scale = weight * mask_flat

    beta_f = float(beta)
    # Sentinel for padded pred lanes: hugely negative after the *beta multiply
    # (so it never wins the row max and exp underflows to 0) yet finite, so
    # no NaN from inf arithmetic on fully-padded rows.
    pad_mag = 1e30 / max(abs(beta_f), 1.0)
    pred_pad = -pad_mag if beta_f >= 0 else pad_mag
    # TODO(synk): beta == 0 is degenerate (uniform log_softmax); padded lanes
    # would leak into the normalizer in that case. SimCC always uses beta > 0.

    lane_w = _round_up(max(p.shape[-1] for p in pred_simcc), _LANE)

    preds, tgts, scales = [], [], []
    for pred, tgt in zip(pred_simcc, gt_simcc):
        w = pred.shape[-1]
        p = pred.reshape(-1, w)
        t = tgt.reshape(-1, w)
        if lane_w != w:
            p = jnp.pad(p, ((0, 0), (0, lane_w - w)), constant_values=pred_pad)
            t_pad = pred_pad if label_softmax else 0.0
            t = jnp.pad(t, ((0, 0), (0, lane_w - w)), constant_values=t_pad)
        preds.append(p)
        tgts.append(t)
        scales.append(base_scale * (1.0 / w))   # fold the row-mean's 1/W

    pred_all = jnp.concatenate(preds, axis=0)
    tgt_all = jnp.concatenate(tgts, axis=0)
    scale_all = jnp.concatenate(scales, axis=0)

    m_tot = pred_all.shape[0]
    tm = min(_MAX_TM, _round_up(m_tot, 8))
    mp = _round_up(m_tot, tm)
    if mp != m_tot:
        pad = mp - m_tot
        # Zero-padded rows give a finite uniform softmax and have scale == 0.
        pred_all = jnp.pad(pred_all, ((0, pad), (0, 0)))
        tgt_all = jnp.pad(tgt_all, ((0, pad), (0, 0)))
        scale_all = jnp.pad(scale_all, ((0, pad),))
    scale2 = scale_all.reshape(mp, 1)

    row_losses = _kl_rows_weighted(pred_all, tgt_all, scale2, beta_f,
                                   label_softmax, tm)
    return jnp.sum(row_losses) / num_joints


def _reference_loss(pred_simcc, gt_simcc, mask, target_weight,
                    beta=1.0, label_softmax=False, use_target_weight=True):
    """Plain-JAX reference mirroring the PyTorch module."""
    k = pred_simcc[0].shape[1]
    if use_target_weight and target_weight is not None:
        weight = target_weight.reshape(-1)
    else:
        weight = 1.0
    total = jnp.float32(0.0)
    for pred, tgt in zip(pred_simcc, gt_simcc):
        p = (pred * mask.reshape(-1, k, 1)).reshape(-1, pred.shape[-1])
        t = (tgt * mask.reshape(-1, k, 1)).reshape(-1, tgt.shape[-1])
        log_pt = jax.nn.log_softmax(p * beta, axis=1)
        if label_softmax:
            t = jax.nn.softmax(t * beta, axis=1)
        pos = t > 0
        kl = jnp.where(pos, t * (jnp.log(jnp.where(pos, t, 1.0)) - log_pt), 0.0)
        row = jnp.mean(kl, axis=1)
        total = total + jnp.sum(row * weight)
    return total / k


if __name__ == "__main__":
    key = jax.random.PRNGKey(0)
    k1, k2, k3, k4, k5, k6 = jax.random.split(key, 6)

    N, K = 2, NUMP          # batch, joints
    Wx, Wy = 48, 32         # SimCC bin counts for x / y axes

    pred_x = jax.random.normal(k1, (N, K, Wx), jnp.float32)
    pred_y = jax.random.normal(k2, (N, K, Wy), jnp.float32)
    # Gaussian-smoothed SimCC targets are non-negative distributions.
    gt_x = jax.nn.softmax(jax.random.normal(k3, (N, K, Wx), jnp.float32), axis=-1)
    gt_y = jax.nn.softmax(jax.random.normal(k4, (N, K, Wy), jnp.float32), axis=-1)
    mask = (jax.random.uniform(k5, (N, K)) > 0.3).astype(jnp.float32)
    target_weight = jax.random.uniform(k6, (N, K), jnp.float32)

    configs = [dict(beta=1.0, label_softmax=False),
               dict(beta=2.0, label_softmax=True)]
    for cfg in configs:
        out = kl_discret_loss((pred_x, pred_y), (gt_x, gt_y), mask,
                              target_weight, use_target_weight=True, **cfg)
        out = jax.block_until_ready(out)
        ref = _reference_loss((pred_x, pred_y), (gt_x, gt_y), mask,
                              target_weight, use_target_weight=True, **cfg)
        np.testing.assert_allclose(np.asarray(out), np.asarray(ref),
                                   rtol=1e-5, atol=1e-5)
    print("KERNEL_OK")
</pallas_src>

<mosaic_0001>
module attributes {stable_mosaic.version = 11 : i64} {
  func.func @_kl_kernel(%arg0: i32, %arg1: memref<16x128xf32, #tpu.memory_space<vmem>>, %arg2: memref<16x128xf32, #tpu.memory_space<vmem>>, %arg3: memref<16x1xf32, #tpu.memory_space<vmem>>, %arg4: memref<16x1xf32, #tpu.memory_space<vmem>>) attributes {dimension_semantics = [#tpu.dimension_semantics<parallel>], iteration_bounds = array<i64: 1>, scalar_prefetch = 0 : i64, scratch_operands = 0 : i64, tpu.core_type = #tpu.core_type<tc>, window_params = [{transform_indices = @transform_0, window_bounds = array<i64: 16, 128>}, {transform_indices = @transform_1, window_bounds = array<i64: 16, 128>}, {transform_indices = @transform_2, window_bounds = array<i64: 16, 1>}, {transform_indices = @transform_3, window_bounds = array<i64: 16, 1>}]} {
    %c0 = arith.constant 0 : index
    %c0_0 = arith.constant 0 : index
    %0 = vector.load %arg1[%c0, %c0_0] : memref<16x128xf32, #tpu.memory_space<vmem>>, vector<16x128xf32>
    %c0_1 = arith.constant 0 : index
    %c0_2 = arith.constant 0 : index
    %1 = vector.load %arg2[%c0_1, %c0_2] : memref<16x128xf32, #tpu.memory_space<vmem>>, vector<16x128xf32>
    %cst = arith.constant 1.000000e+00 : f32
    %2 = vector.broadcast %cst : f32 to vector<16x128xf32>
    %3 = arith.mulf %0, %2 : vector<16x128xf32>
    %cst_3 = arith.constant dense<0xFF800000> : vector<16xf32>
    %4 = vector.multi_reduction <maximumf>, %3, %cst_3 [1] : vector<16x128xf32> to vector<16xf32>
    %5 = vector.shape_cast %4 : vector<16xf32> to vector<16x1xf32>
    %6 = vector.broadcast %5 : vector<16x1xf32> to vector<16x128xf32>
    %7 = arith.subf %3, %6 : vector<16x128xf32>
    %8 = math.exp %7 : vector<16x128xf32>
    %cst_4 = arith.constant dense<0.000000e+00> : vector<16xf32>
    %9 = vector.multi_reduction <add>, %8, %cst_4 [1] : vector<16x128xf32> to vector<16xf32>
    %10 = vector.shape_cast %9 : vector<16xf32> to vector<16x1xf32>
    %11 = math.log %10 : vector<16x1xf32>
    %12 = vector.broadcast %11 : vector<16x1xf32> to vector<16x128xf32>
    %13 = arith.subf %7, %12 : vector<16x128xf32>
    %cst_5 = arith.constant 0.000000e+00 : f32
    %14 = vector.broadcast %cst_5 : f32 to vector<16x128xf32>
    %15 = arith.cmpf ogt, %1, %14 : vector<16x128xf32>
    %cst_6 = arith.constant 1.000000e+00 : f32
    %16 = vector.broadcast %cst_6 : f32 to vector<16x128xf32>
    %17 = arith.select %15, %1, %16 : vector<16x128xi1>, vector<16x128xf32>
    %18 = math.log %17 : vector<16x128xf32>
    %19 = arith.subf %18, %13 : vector<16x128xf32>
    %20 = arith.mulf %1, %19 : vector<16x128xf32>
    %cst_7 = arith.constant 0.000000e+00 : f32
    %21 = vector.broadcast %cst_7 : f32 to vector<16x128xf32>
    %22 = arith.select %15, %20, %21 : vector<16x128xi1>, vector<16x128xf32>
    %cst_8 = arith.constant dense<0.000000e+00> : vector<16xf32>
    %23 = vector.multi_reduction <add>, %22, %cst_8 [1] : vector<16x128xf32> to vector<16xf32>
    %24 = vector.shape_cast %23 : vector<16xf32> to vector<16x1xf32>
    %c0_9 = arith.constant 0 : index
    %c0_10 = arith.constant 0 : index
    %25 = vector.load %arg3[%c0_9, %c0_10] : memref<16x1xf32, #tpu.memory_space<vmem>>, vector<16x1xf32>
    %26 = arith.mulf %24, %25 : vector<16x1xf32>
    %c0_11 = arith.constant 0 : index
    %c0_12 = arith.constant 0 : index
    %27 = vector.load %arg4[%c0_11, %c0_12] : memref<16x1xf32, #tpu.memory_space<vmem>>, vector<16x1xf32>
    tpu.vector_store %arg4[%c0_11, %c0_12], %26 {strides = array<i32>} : memref<16x1xf32, #tpu.memory_space<vmem>>, vector<16x1xf32>,
    return
  }
  func.func @transform_0(%arg0: i32) -> (i32, i32) {
    %c0_i32 = arith.constant 0 : i32
    %c0_i32_0 = arith.constant 0 : i32
    return %arg0, %c0_i32 : i32, i32
  }
  func.func @transform_1(%arg0: i32) -> (i32, i32) {
    %c0_i32 = arith.constant 0 : i32
    %c0_i32_0 = arith.constant 0 : i32
    return %arg0, %c0_i32 : i32, i32
  }
  func.func @transform_2(%arg0: i32) -> (i32, i32) {
    %c0_i32 = arith.constant 0 : i32
    %c0_i32_0 = arith.constant 0 : i32
    return %arg0, %c0_i32 : i32, i32
  }
  func.func @transform_3(%arg0: i32) -> (i32, i32) {
    %c0_i32 = arith.constant 0 : i32
    %c0_i32_0 = arith.constant 0 : i32
    return %arg0, %c0_i32 : i32, i32
  }
}

</mosaic_0001>

<bundles_post_ra>
// kernel: tpu_custom_call.1
= control target key start
LH: loop header
LB: loop body
LE: loop exit
PB: predicated region body
PF: predicated region fallthrough
CT: control target
= control target key end

     0   :  { %8 = vsyncpa [#allocation3], 0  ;;  %s121_s12 = smov [#allocation2]   ;;  %s178_s0 = inlined_call_operand.vmem [shape: f32[16,128], index: 0, kind: input, shape index: {}]   ;;  %s179_s1 = inlined_call_operand.hbm [shape: f32[16,128], index: 1, kind: input, shape index: {}]   ;;  %s180_s2 = inlined_call_operand.vmem [shape: f32[16,1], index: 2, kind: input, shape index: {}]   ;;  %s181_s3 = inlined_call_operand.vmem [shape: f32[16,1], index: 3, kind: output, shape index: {}]  }
   0x1   :  { %s16_s13 = sshll.u32 %s121_s12, 4  ;;  %s97_s16 = scalar_lea.hbm %s179_s1, 256  ;;  %s17_s13 = int_to_ptr.vmem [resolvable:$true] %s16_s13 }
   0x2   :  { %p98_p0 = scmp.ne.s32.totalorder %s179_s1, %s97_s16  ;;  %p101_p1 = scmp.lt.u32.totalorder %s97_s16, %s179_s1 }
   0x4   :  { %p103_p2 = pnand %p101_p1, %p98_p0 }
   0x6   :  { %106 = shalt.err (!%p103_p2)
}
   0x7   :  { %s107_s21 = scalar_lea.vmem %s17_s13, 256  ;;  %p112_p4 = scmp.lt.s32.totalorder %s17_s13, %s17_s13 }
   0x8   :  { %p108_p3 = scmp.ne.s32.totalorder %s17_s13, %s107_s21  ;;  %p113_p5 = scmp.lt.s32.totalorder %s107_s21, %s107_s21 }
   0xa   :  { %p114_p6 = por %p113_p5, %p112_p4 }
   0xc   :  { %p115_p7 = pnand %p114_p6, %p108_p3 }
   0xe   :  { %118 = shalt.err (!%p115_p7)
}
   0xf   :  { %s122_s22 = smov 128   ;;  %s123_s23 = smov 8  }
  0x10   :  { %22 = dma.hbm_to_vmem [thread:$0]  %s179_s1, 256, %s17_s13, [#allocation3], %s122_s22, %s122_s22, %s123_s23  }
  0x11   :  { %119 = dma.done.wait [#allocation3], 256  }
  0x12   :  { %120 = vsyncadd [#allocation3], 4294967040  ;;  %v28_v0 = vld [vmem:[%s178_s0] sm:$0xff]  ;;  %v29_v1 = vld [vmem:[%s178_s0 + $0x8] sm:$0xff]  ;;  %vm74_vm2 = vcmask 7168  }
  0x13   :  { %32 = vmax.xlane.f32.xlu0 %v28_v0  ;;  %v30_v10 = vld [vmem:[#allocation2] sm:$0xff]  ;;  %v31_v11 = vld [vmem:[#allocation2 + $0x8] sm:$0xff] }
  0x14   :  { %vm52_vm0 = vcmp.gt.f32.partialorder %v30_v10, 0.0  ;;  %vm53_vm1 = vcmp.gt.f32.partialorder %v31_v11, 0.0  ;;  %v70_v32 = vld [vmem:[%s180_s2] sm:$0xff]  ;;  %v71_v35 = vld [vmem:[%s180_s2 + $0x8] sm:$0xff] }
  0x15   :  { %v54_v12 = vsel %vm52_vm0, %v30_v10, 1.0  ;;  %v55_v14 = vsel %vm53_vm1, %v31_v11, 1.0 }
  0x17   :  { %34 = vmax.xlane.f32.xlu0 %v29_v1 }
  0xa0   :  { %v33_v2 = vpop.xlane.xlu0 %32 }
  0xa1   :  { %v36_v3 = vsub.f32 %v28_v0, %v33_v2 }
  0xa3   :  { %v38_v4 = vmul.f32 1.442695, %v36_v3 }
  0xa4   :  { %v35_v5 = vpop.xlane.xlu0 %34 }
  0xa5   :  { %v37_v6 = vsub.f32 %v29_v1, %v35_v5  ;;  %85 = vpow2.f32 %v38_v4 }
  0xa7   :  { %v40_v7 = vmul.f32 1.442695, %v37_v6 }
  0xa9   :  { %87 = vpow2.f32 %v40_v7 }
  0xaa   :  { %89 = vlog2.f32 %v54_v12 }
  0xaf   :  { %v86_v8 = vpop.eup %85 }
  0xb0   :  { %42 = vadd.xlane.f32.xlu1 %v86_v8 }
  0xb3   :  { %v88_v9 = vpop.eup %87 }
  0xb4   :  { %44 = vadd.xlane.f32.xlu1 %v88_v9  ;;  %v90_v16 = vpop.eup %89 }
  0xb5   :  { %v57_v19 = vmul.f32 0.6931472, %v90_v16 }
 0x13d   :  { %v43_v13 = vpop.xlane.xlu1 %42 }
 0x13e   :  { %91 = vlog2.f32 %v43_v13 }
 0x13f   :  { %93 = vlog2.f32 %v55_v14 }
 0x141   :  { %v45_v15 = vpop.xlane.xlu1 %44 }
 0x142   :  { %95 = vlog2.f32 %v45_v15 }
 0x148   :  { %v92_v17 = vpop.eup %91 }
 0x149   :  { %v47_v18 = vmul.f32 0.6931472, %v92_v17  ;;  %v94_v20 = vpop.eup %93 }
 0x14a   :  { %v59_v25 = vmul.f32 0.6931472, %v94_v20 }
 0x14b   :  { %v50_v21 = vsub.f32 %v36_v3, %v47_v18 }
 0x14c   :  { %v96_v22 = vpop.eup %95 }
 0x14d   :  { %v49_v23 = vmul.f32 0.6931472, %v96_v22  ;;  %v60_v24 = vsub.f32 %v57_v19, %v50_v21 }
 0x14f   :  { %v51_v26 = vsub.f32 %v37_v6, %v49_v23  ;;  %v62_v27 = vmul.f32 %v60_v24, %v30_v10 }
 0x151   :  { %v64_v28 = vsel %vm52_vm0, %v62_v27, 0.0  ;;  %v61_v29 = vsub.f32 %v59_v25, %v51_v26 }
 0x152   :  { %66 = vadd.xlane.f32.xlu0 %v64_v28 }
 0x153   :  { %v63_v30 = vmul.f32 %v61_v29, %v31_v11 }
 0x155   :  { %v65_v31 = vsel %vm53_vm1, %v63_v30, 0.0 }
 0x156   :  { %68 = vadd.xlane.f32.xlu1 %v65_v31 }
 0x1df   :  { %v67_v33 = vpop.xlane.xlu0 %66 }
 0x1e0   :  { %v72_v34 = vmul.f32 %v70_v32, %v67_v33 }
 0x1e2   :  { %75 = vst.msk [vmem:[%s181_s3] sm:$0xff] %vm74_vm2, %v72_v34 }
 0x1e3   :  { %v69_v36 = vpop.xlane.xlu1 %68 }
 0x1e4   :  { %v73_v37 = vmul.f32 %v71_v35, %v69_v36 }
 0x1e6   :  { %76 = vst.msk [vmem:[%s181_s3 + $0x8] sm:$0xff] %vm74_vm2, %v73_v37 }
 0x1e7   :  { %81 = vsyncpa [#allocation3], 1 }

</bundles_post_ra>
